<compile_context>
chip_gen: v7x
topology: tpu7x:2x2x1
jax: 0.10.0
libtpu: 0.0.40
codegen_flags: <defaults>
</compile_context>

<pallas_src>
import functools

import numpy as np
import jax
import jax.numpy as jnp
from jax.experimental import pallas as pl
from jax.experimental.pallas import tpu as pltpu

LRELU_SLOPE = 0.1
_HALO = 128                       # halo block size (one 128-lane block)

_VMEM_LIMIT_CACHE = None


def _vmem_limit_bytes():
    """Per-generation scoped-VMEM limit (v7x ~48 MiB, v5e/v6e ~96 MiB)."""
    global _VMEM_LIMIT_CACHE
    if _VMEM_LIMIT_CACHE is None:
        cap = 128 * 1024 * 1024
        try:
            info = pltpu.get_tpu_info()
            cap = int(getattr(info, 'vmem_capacity_bytes', cap))
        except Exception:
            pass
        _VMEM_LIMIT_CACHE = min(int(cap * 3 // 4), 100 * 1024 * 1024)
    return _VMEM_LIMIT_CACHE


def _cdiv(a, b):
    return -(-a // b)


def _round_up(a, b):
    return _cdiv(a, b) * b


def _leaky(x, slope=LRELU_SLOPE):
    return jnp.where(x >= 0, x, x * slope)


# -----------------------------------------------------------------------------
# One-time parameter preprocessing (weights rearranged into MXU-ready matrices)
# -----------------------------------------------------------------------------
def prep_conv(w, b, dtype):
    """Conv1d weight (Cout, Cin, K) -> (Cout, K*Cin) tap-major + f32 bias column."""
    Cout, Cin, K = w.shape
    wm = jnp.transpose(w, (0, 2, 1)).reshape(Cout, K * Cin).astype(dtype)
    bias = None if b is None else b.reshape(Cout, 1).astype(jnp.float32)
    return {'wmat': wm, 'bias': bias, 'K': K, 'Cin': Cin, 'Cout': Cout}


def prep_conv_strided(w, b, stride, padding, dtype):
    """Strided Conv1d: wrapper does the phase-split im2col, so the kernel sees a
    dense K_eff=1 conv with Cin_eff = K*Cin (column order k*Cin + ci)."""
    Cout, Cin, K = w.shape
    w_flat = jnp.transpose(w, (0, 2, 1)).reshape(Cout, K * Cin, 1)
    return {'conv': prep_conv(w_flat, b, dtype), 'K': K, 'Cin': Cin,
            'Cout': Cout, 'stride': stride, 'padding': padding}


def prep_conv_transpose(w_t, b, stride, padding, dtype):
    """Polyphase decomposition of ConvTranspose1d (weight (Cin, Cout, K)):
    one stride-1 conv with stacked phase kernels (s*Cout output channels)."""
    Cin, Cout, K = w_t.shape
    s = stride
    assert K >= s and 0 <= padding < s, "polyphase path expects K >= stride, 0 <= pad < stride"
    phases = []
    for p in range(s):
        k0 = (p + padding) % s
        off = (p + padding) // s
        M = (K - k0 + s - 1) // s
        phases.append((k0, off, M))
    lo = min(off - M + 1 for (_, off, M) in phases)
    hi = max(off for (_, off, _) in phases)
    Wwin = hi - lo + 1
    Wu = jnp.zeros((s, Cout, Cin, Wwin), w_t.dtype)
    for p, (k0, off, M) in enumerate(phases):
        for m in range(M):
            Wu = Wu.at[p, :, :, off - m - lo].set(w_t[:, :, k0 + m * s].T)
    w_conv = Wu.reshape(s * Cout, Cin, Wwin)
    b_full = jnp.tile(b, s) if b is not None else None
    return {'conv': prep_conv(w_conv, b_full, dtype), 'stride': s,
            'padding': padding, 'K': K, 'Cout': Cout, 'pad_left': -lo}


# -----------------------------------------------------------------------------
# The Pallas kernel: time-tiled (optionally chained) conv with fused epilogue
# -----------------------------------------------------------------------------
def _conv_tile_kernel(*refs, TT, K1, d1, K2, c0, lpad, wtot, in_len, valid_len,
                      mid_pad, use_lhalo, use_rhalo, mask_input, has_b1, has_b2,
                      has_add, has_add2, add_res, pre_lrelu, lrelu_slope,
                      scale, post_tanh, cdt):
    i = 0
    lh_ref = None
    if use_lhalo:
        lh_ref = refs[i]; i += 1       # (1, Cin, 128) left halo block
    x_ref = refs[i]; i += 1            # (1, Cin, TT)  current time tile
    rh_ref = None
    if use_rhalo:
        rh_ref = refs[i]; i += 1       # (1, Cin, 128) right halo block
    w1_ref = refs[i]; i += 1           # (Cmid, K1*Cin) tap-fused weights
    b1_ref = None
    if has_b1:
        b1_ref = refs[i]; i += 1       # (Cmid, 1) f32
    w2_ref = None
    b2_ref = None
    if K2 > 0:
        w2_ref = refs[i]; i += 1       # (Cout, K2*Cmid)
        if has_b2:
            b2_ref = refs[i]; i += 1   # (Cout, 1) f32
    add_ref = None
    if has_add:
        add_ref = refs[i]; i += 1      # (1, Cout, TT) added in epilogue
    add2_ref = None
    if has_add2:
        add2_ref = refs[i]; i += 1     # (1, Cout, TT) running-sum added in epilogue
    o_ref = refs[-1]                   # (1, Cout, TT)

    j = pl.program_id(1)

    pieces = []
    if use_lhalo:
        pieces.append(lh_ref[0])
    pieces.append(x_ref[0])
    if use_rhalo:
        pieces.append(rh_ref[0])
    win = pieces[0] if len(pieces) == 1 else jnp.concatenate(pieces, axis=-1)

    # Zero everything outside [0, in_len): replaces the old jnp.pad of the
    # whole activation (halo blocks are clamped at the array edges and may
    # carry misplaced / unspecified data there).
    if mask_input:
        pos = jax.lax.broadcasted_iota(jnp.int32, (1, wtot), 1) + (j * TT - lpad)
        win = jnp.where((pos >= 0) & (pos < in_len), win, jnp.zeros_like(win))

    res = None
    if add_res:
        # residual (x) sliced from the already-loaded window: no second DMA
        res = win[:, lpad:lpad + TT].astype(jnp.float32)

    if pre_lrelu:
        win = jnp.where(win >= 0, win, win * lrelu_slope)
    win = win.astype(cdt)

    halo2 = K2 - 1 if K2 > 0 else 0
    wid1 = TT + halo2
    # im2col on the contraction axis: K taps stacked -> one MXU matmul
    parts = [win[:, c0 + k * d1: c0 + k * d1 + wid1] for k in range(K1)]
    st1 = parts[0] if K1 == 1 else jnp.concatenate(parts, axis=0)
    y = jnp.dot(w1_ref[...], st1, preferred_element_type=jnp.float32)
    if has_b1:
        y = y + b1_ref[...]            # bias in f32 epilogue (no ones-row in MXU)

    if K2 > 0:
        # fused ResBlock branch: leaky-relu + second conv, intermediate stays in VMEM
        y = jnp.where(y >= 0, y, y * lrelu_slope)
        # PyTorch zero-pads the *intermediate* activation for conv2: zero the
        # columns that fall outside the valid intermediate range.
        icol = jax.lax.broadcasted_iota(jnp.int32, (1, wid1), 1)
        ipos = icol + (j * TT - mid_pad)
        y = jnp.where((ipos >= 0) & (ipos < valid_len), y, 0.0)
        h = y.astype(cdt)
        parts2 = [h[:, k:k + TT] for k in range(K2)]
        st2 = parts2[0] if K2 == 1 else jnp.concatenate(parts2, axis=0)
        y = jnp.dot(w2_ref[...], st2, preferred_element_type=jnp.float32)
        if has_b2:
            y = y + b2_ref[...]

    if add_res:
        y = y + res
    if has_add:
        y = y + add_ref[0].astype(jnp.float32)
    if scale is not None:
        y = y * scale
    if has_add2:
        y = y + add2_ref[0].astype(jnp.float32)
    if post_tanh:
        y = jnp.tanh(y)
    o_ref[0] = y.astype(o_ref.dtype)


def conv1d_pallas(x, cw, *, dilation=1, pad_left, out_len, pre_lrelu=False,
                  lrelu_slope=LRELU_SLOPE, cw2=None, mid_pad=0, add=None,
                  add2=None, add_input_residual=False, scale=None,
                  post_tanh=False, out_dtype=None, tile_t=None):
    """Stride-1 (optionally dilated, optionally chained) Conv1d on (B, Cin, T).

    The input is NOT pre-padded; boundaries are handled in-kernel with a
    position mask, the left/right context comes from 128-lane halo blocks."""
    B, Cin, T = x.shape
    assert Cin == cw['Cin'], (Cin, cw['Cin'])
    K1, d1 = cw['K'], dilation
    halo2 = (cw2['K'] - 1) if cw2 is not None else 0
    halo_total = (K1 - 1) * d1 + halo2
    assert 0 <= pad_left <= _HALO, pad_left
    assert halo_total - pad_left <= _HALO, (halo_total, pad_left)
    if cw2 is not None:
        assert cw2['Cin'] == cw['Cout']
    Cout = cw2['Cout'] if cw2 is not None else cw['Cout']
    if add_input_residual:
        assert Cin == Cout
    out_dtype = x.dtype if out_dtype is None else out_dtype

    # ---- adaptive time tile: ~constant bytes per stream --------------------
    if tile_t is None:
        TT = _round_up(max((512 * 512) // max(Cin, 1), 128), 128)
        TT = max(256, min(TT, 2048))
    else:
        assert tile_t % 128 == 0
        TT = tile_t
    TT = min(TT, _round_up(max(out_len, 1), 128))
    # keep both v7x TensorCores busy when B*NT would otherwise be 1
    while tile_t is None and B * _cdiv(out_len, TT) < 2 and TT > 128:
        TT = max(128, _round_up(TT // 2, 128))
    NT = _cdiv(out_len, TT)
    assert (NT - 1) * TT < T, (out_len, TT, T)

    ttb = TT // _HALO
    nb128 = _cdiv(T, _HALO)
    use_lhalo = pad_left > 0
    use_rhalo = (halo_total - pad_left) > 0
    lpad = _HALO if use_lhalo else 0
    wtot = lpad + TT + (_HALO if use_rhalo else 0)

    in_arrays, in_specs = [], []
    if use_lhalo:
        in_arrays.append(x)
        in_specs.append(pl.BlockSpec(
            (1, Cin, _HALO),
            lambda b, j: (b, 0, jnp.maximum(j * ttb - 1, 0))))
    in_arrays.append(x)
    in_specs.append(pl.BlockSpec((1, Cin, TT), lambda b, j: (b, 0, j)))
    if use_rhalo:
        in_arrays.append(x)
        in_specs.append(pl.BlockSpec(
            (1, Cin, _HALO),
            lambda b, j: (b, 0, jnp.minimum((j + 1) * ttb, nb128 - 1))))

    in_arrays.append(cw['wmat'])
    in_specs.append(pl.BlockSpec(cw['wmat'].shape, lambda b, j: (0, 0)))
    if cw['bias'] is not None:
        in_arrays.append(cw['bias'])
        in_specs.append(pl.BlockSpec(cw['bias'].shape, lambda b, j: (0, 0)))
    if cw2 is not None:
        in_arrays.append(cw2['wmat'])
        in_specs.append(pl.BlockSpec(cw2['wmat'].shape, lambda b, j: (0, 0)))
        if cw2['bias'] is not None:
            in_arrays.append(cw2['bias'])
            in_specs.append(pl.BlockSpec(cw2['bias'].shape, lambda b, j: (0, 0)))
    if add is not None:
        assert add.shape == (B, Cout, out_len), (add.shape, (B, Cout, out_len))
        in_arrays.append(add)
        in_specs.append(pl.BlockSpec((1, Cout, TT), lambda b, j: (b, 0, j)))
    if add2 is not None:
        assert add2.shape == (B, Cout, out_len)
        in_arrays.append(add2)
        in_specs.append(pl.BlockSpec((1, Cout, TT), lambda b, j: (b, 0, j)))

    kernel = functools.partial(
        _conv_tile_kernel, TT=TT, K1=K1, d1=d1,
        K2=(cw2['K'] if cw2 is not None else 0),
        c0=lpad - pad_left, lpad=lpad, wtot=wtot, in_len=T, valid_len=out_len,
        mid_pad=mid_pad, use_lhalo=use_lhalo, use_rhalo=use_rhalo,
        mask_input=(use_lhalo or use_rhalo),
        has_b1=cw['bias'] is not None,
        has_b2=(cw2 is not None and cw2['bias'] is not None),
        has_add=add is not None, has_add2=add2 is not None,
        add_res=add_input_residual, pre_lrelu=pre_lrelu,
        lrelu_slope=lrelu_slope, scale=scale, post_tanh=post_tanh,
        cdt=cw['wmat'].dtype)

    return pl.pallas_call(
        kernel,
        grid=(B, NT),
        in_specs=in_specs,
        out_specs=pl.BlockSpec((1, Cout, TT), lambda b, j: (b, 0, j)),
        out_shape=jax.ShapeDtypeStruct((B, Cout, out_len), out_dtype),
        compiler_params=pltpu.CompilerParams(
            dimension_semantics=("parallel", "parallel"),
            vmem_limit_bytes=_vmem_limit_bytes()),
    )(*in_arrays)


def conv_transpose1d_pallas(x, cwt, *, pre_lrelu, lrelu_slope=LRELU_SLOPE,
                            tile_t=None):
    """Polyphase ConvTranspose1d: one dense stride-1 conv for all phases, then
    a wrapper-side interleave of the phase outputs."""
    B, Cin, T = x.shape
    s, K, pad, Cout = cwt['stride'], cwt['K'], cwt['padding'], cwt['Cout']
    Tout = (T - 1) * s - 2 * pad + K
    Tq = _cdiv(Tout, s)
    y = conv1d_pallas(x, cwt['conv'], dilation=1, pad_left=cwt['pad_left'],
                      out_len=Tq, pre_lrelu=pre_lrelu, lrelu_slope=lrelu_slope,
                      tile_t=tile_t)                       # (B, s*Cout, Tq)
    # TODO(synk): fuse the phase interleave into the kernel output (needs a
    # strided / permuted out spec); currently one XLA transpose per stage.
    y = y.reshape(B, s, Cout, Tq).transpose(0, 2, 3, 1).reshape(B, Cout, Tq * s)
    return y[:, :, :Tout]


def noise_conv_pallas(har, cws, *, add=None, tile_t=None):
    """Strided Conv1d (the noise_convs): phase-split im2col in the wrapper so
    the kernel is a single dense matmul; `x + x_source` fused via `add`.
    (har is a single-channel signal, so the wrapper pad/slices are cheap.)"""
    B, Cin, T = har.shape
    K, s, pad = cws['K'], cws['stride'], cws['padding']
    Tout = (T + 2 * pad - K) // s + 1
    need = (Tout - 1) * s + K
    harp = jnp.pad(har, ((0, 0), (0, 0), (pad, max(0, need - T - pad))))
    cols = [jax.lax.slice_in_dim(harp, k, k + (Tout - 1) * s + 1, stride=s, axis=2)
            for k in range(K)]
    xim = cols[0] if K == 1 else jnp.concatenate(cols, axis=1)   # (B, K*Cin, Tout)
    return conv1d_pallas(xim, cws['conv'], pad_left=0, out_len=Tout, add=add,
                         tile_t=tile_t)


# -----------------------------------------------------------------------------
# SineGen / SourceModuleHnNSF (plain JAX glue; deterministic PRNG)
# -----------------------------------------------------------------------------
def sine_gen(f0, upp, sr, key, *, harmonic_num=0, sine_amp=0.1,
             noise_std=0.003, voiced_threshold=0.0):
    B, L = f0.shape
    dim = harmonic_num + 1
    f0e = f0[:, :, None]
    mult = jnp.arange(1, dim + 1, dtype=f0.dtype)
    f0_buf = f0e * mult
    rad = (f0_buf / sr) % 1.0
    k1, k2 = jax.random.split(key)
    rand_ini = jax.random.uniform(k1, (B, dim), dtype=f0.dtype)
    rand_ini = rand_ini.at[:, 0].set(0.0)
    rad = rad.at[:, 0, :].add(rand_ini)
    tmp = jnp.cumsum(rad, axis=1) * upp
    Lo = L * upp
    pos = jnp.arange(Lo, dtype=f0.dtype) * (L - 1) / (Lo - 1)
    lo = jnp.floor(pos).astype(jnp.int32)
    hi = jnp.minimum(lo + 1, L - 1)
    frac = (pos - lo.astype(f0.dtype))[None, :, None]
    tmp_up = tmp[:, lo, :] * (1.0 - frac) + tmp[:, hi, :] * frac
    rad_up = jnp.repeat(rad, upp, axis=1)
    tmp_up = tmp_up % 1.0
    neg = (tmp_up[:, 1:, :] - tmp_up[:, :-1, :]) < 0
    shift = jnp.concatenate(
        [jnp.zeros((B, 1, dim), f0.dtype), -1.0 * neg.astype(f0.dtype)], axis=1)
    sine = jnp.sin(jnp.cumsum(rad_up + shift, axis=1) * 2.0 * np.pi) * sine_amp
    uv = (f0e > voiced_threshold).astype(f0.dtype)
    uv_up = jnp.repeat(uv, upp, axis=1)
    noise_amp = uv_up * noise_std + (1.0 - uv_up) * sine_amp / 3.0
    noise = noise_amp * jax.random.normal(k2, sine.shape, dtype=f0.dtype)
    sine = sine * uv_up + noise
    return sine, uv_up


def source_module_hn_nsf(lin_params, f0, upp, sr, key):
    # TODO(synk): SineGen/SourceModuleHnNSF equivalence to the PyTorch RNG /
    # F.interpolate path is approximated with plain JAX (kept out of Pallas).
    sine_wavs, _uv = sine_gen(f0, upp, sr, key)                  # (B, L*upp, 1)
    sine_merge = jnp.tanh(sine_wavs @ lin_params['w'].T + lin_params['b'])
    return jnp.transpose(sine_merge, (0, 2, 1))                  # (B, 1, L*upp)


# -----------------------------------------------------------------------------
# Parameter prep for the whole generator
# -----------------------------------------------------------------------------
def prepare_params(params, cfg, dtype):
    kp = {'dtype': dtype}
    kp['source_linear'] = params['source_linear']
    kp['cond'] = params['cond']
    kp['conv_pre'] = prep_conv(params['conv_pre']['w'], params['conv_pre']['b'], dtype)
    n_up = len(cfg['upsample_rates'])
    nk = len(cfg['resblock_kernel_sizes'])
    kp['ups'], kp['noise_convs'] = [], []
    for i, (u, k_up) in enumerate(zip(cfg['upsample_rates'],
                                      cfg['upsample_kernel_sizes'])):
        kp['ups'].append(prep_conv_transpose(params['ups'][i]['w'],
                                             params['ups'][i]['b'],
                                             stride=u, padding=(k_up - u) // 2,
                                             dtype=dtype))
        nc = params['noise_convs'][i]
        if i + 1 < n_up:
            sf = int(np.prod(cfg['upsample_rates'][i + 1:]))
            kp['noise_convs'].append(
                prep_conv_strided(nc['w'], nc['b'], stride=sf, padding=sf // 2,
                                  dtype=dtype))
        else:
            kp['noise_convs'].append(
                prep_conv_strided(nc['w'], nc['b'], stride=1, padding=0, dtype=dtype))
    kp['resblocks'] = []
    for i in range(n_up):
        for j, (k, dil) in enumerate(zip(cfg['resblock_kernel_sizes'],
                                         cfg['resblock_dilation_sizes'])):
            rb = params['resblocks'][i * nk + j]
            branches = []
            for c1, c2, d in zip(rb['convs1'], rb['convs2'], dil):
                pad1 = (k * d - d) // 2
                pad2 = (k - 1) // 2
                branches.append({'c1': prep_conv(c1['w'], c1['b'], dtype),
                                 'c2': prep_conv(c2['w'], c2['b'], dtype),
                                 'd': d, 'pad_left': pad1 + pad2, 'mid_pad': pad2})
            kp['resblocks'].append({'branches': branches})
    kp['conv_post'] = prep_conv(params['conv_post']['w'], None, dtype)
    return kp


# -----------------------------------------------------------------------------
# GeneratorNSF forward (Pallas path)
# -----------------------------------------------------------------------------
def generator_nsf_forward_pallas(kp, x, f0, g, cfg, noise_key, tile_t=None):
    dtype = kp['dtype']
    upp = int(np.prod(cfg['upsample_rates']))
    har = source_module_hn_nsf(kp['source_linear'], f0, upp, cfg['sr'], noise_key)
    har = har.astype(dtype)
    x = x.astype(dtype)
    T = x.shape[2]
    x = conv1d_pallas(x, kp['conv_pre'], pad_left=3, out_len=T, tile_t=tile_t)
    if g is not None and kp['cond'] is not None:
        # TODO(synk): 1x1 `cond` conv is a single-frame matvec; kept in plain XLA.
        cond = (jnp.einsum('oi,bit->bot', kp['cond']['w'][:, :, 0], g)
                + kp['cond']['b'][None, :, None])
        x = (x.astype(jnp.float32) + cond).astype(dtype)

    nk = len(cfg['resblock_kernel_sizes'])
    for i in range(len(cfg['upsample_rates'])):
        # leaky_relu fused as pre-activation of the polyphase transposed conv
        x = conv_transpose1d_pallas(x, kp['ups'][i], pre_lrelu=True, tile_t=tile_t)
        T = x.shape[2]
        # x = x + noise_convs[i](har)  (the add is fused into the conv epilogue)
        x = noise_conv_pallas(har, kp['noise_convs'][i], add=x, tile_t=tile_t)
        xs = None
        for j in range(nk):
            rb = kp['resblocks'][i * nk + j]
            xcur = x
            nbr = len(rb['branches'])
            # keep the running sum xs in f32 between pallas_calls; only the
            # final per-stage result is quantized back to the activation dtype
            xs_dtype = jnp.float32 if (j + 1 < nk) else dtype
            for bi, br in enumerate(rb['branches']):
                last = (bi == nbr - 1)
                if last:
                    # epilogue: (conv_chain + branch_residual) / nk + running xs
                    xs = conv1d_pallas(
                        xcur, br['c1'], dilation=br['d'], pad_left=br['pad_left'],
                        out_len=T, pre_lrelu=True, cw2=br['c2'],
                        mid_pad=br['mid_pad'], add_input_residual=True,
                        scale=1.0 / nk, add2=xs, out_dtype=xs_dtype,
                        tile_t=tile_t)
                else:
                    xcur = conv1d_pallas(
                        xcur, br['c1'], dilation=br['d'], pad_left=br['pad_left'],
                        out_len=T, pre_lrelu=True, cw2=br['c2'],
                        mid_pad=br['mid_pad'], add_input_residual=True,
                        tile_t=tile_t)
        x = xs
    # final leaky_relu (PyTorch default slope 0.01) + conv_post + tanh, fused
    x = conv1d_pallas(x, kp['conv_post'], pad_left=3, out_len=x.shape[2],
                      pre_lrelu=True, lrelu_slope=0.01, post_tanh=True,
                      out_dtype=jnp.float32, tile_t=tile_t)
    return x


# -----------------------------------------------------------------------------
# Pure-JAX reference (lax convs) for correctness checks
# -----------------------------------------------------------------------------
def conv1d_ref(x, w, b, *, stride=1, padding=0, dilation=1):
    y = jax.lax.conv_general_dilated(
        x, w, window_strides=(stride,), padding=[(padding, padding)],
        rhs_dilation=(dilation,), dimension_numbers=('NCH', 'OIH', 'NCH'))
    if b is not None:
        y = y + b[None, :, None]
    return y


def conv_transpose1d_ref(x, w_t, b, *, stride, padding):
    Cin, Cout, K = w_t.shape
    w = jnp.flip(w_t, axis=2).transpose(1, 0, 2)
    y = jax.lax.conv_general_dilated(
        x, w, window_strides=(1,), padding=[(K - 1 - padding, K - 1 - padding)],
        lhs_dilation=(stride,), dimension_numbers=('NCH', 'OIH', 'NCH'))
    if b is not None:
        y = y + b[None, :, None]
    return y


def generator_nsf_forward_ref(params, x, f0, g, cfg, noise_key):
    upp = int(np.prod(cfg['upsample_rates']))
    har = source_module_hn_nsf(params['source_linear'], f0, upp, cfg['sr'], noise_key)
    x = conv1d_ref(x, params['conv_pre']['w'], params['conv_pre']['b'], padding=3)
    if g is not None and params['cond'] is not None:
        x = x + conv1d_ref(g, params['cond']['w'], params['cond']['b'])
    nk = len(cfg['resblock_kernel_sizes'])
    n_up = len(cfg['upsample_rates'])
    for i, (u, k_up) in enumerate(zip(cfg['upsample_rates'],
                                      cfg['upsample_kernel_sizes'])):
        x = _leaky(x, LRELU_SLOPE)
        x = conv_transpose1d_ref(x, params['ups'][i]['w'], params['ups'][i]['b'],
                                 stride=u, padding=(k_up - u) // 2)
        nc = params['noise_convs'][i]
        if i + 1 < n_up:
            sf = int(np.prod(cfg['upsample_rates'][i + 1:]))
            x = x + conv1d_ref(har, nc['w'], nc['b'], stride=sf, padding=sf // 2)
        else:
            x = x + conv1d_ref(har, nc['w'], nc['b'])
        xs = None
        for j in range(nk):
            rb = params['resblocks'][i * nk + j]
            k = cfg['resblock_kernel_sizes'][j]
            dil = cfg['resblock_dilation_sizes'][j]
            xr = x
            for c1, c2, d in zip(rb['convs1'], rb['convs2'], dil):
                t = _leaky(xr, LRELU_SLOPE)
                t = conv1d_ref(t, c1['w'], c1['b'], padding=(k * d - d) // 2, dilation=d)
                t = _leaky(t, LRELU_SLOPE)
                t = conv1d_ref(t, c2['w'], c2['b'], padding=(k - 1) // 2)
                xr = t + xr
            xs = xr if xs is None else xs + xr
        x = xs / nk
    x = _leaky(x, 0.01)
    x = conv1d_ref(x, params['conv_post']['w'], None, padding=3)
    return jnp.tanh(x)


# -----------------------------------------------------------------------------
# Deterministic parameter initialization (shapes follow GeneratorNSF.__init__)
# -----------------------------------------------------------------------------
def _init_conv(key, cout, cin, k, bias=True, scale=0.05):
    kw, kb = jax.random.split(key)
    w = scale * jax.random.normal(kw, (cout, cin, k), jnp.float32)
    b = scale * jax.random.normal(kb, (cout,), jnp.float32) if bias else None
    return {'w': w, 'b': b}


def init_params(key, cfg):
    uic = cfg['upsample_initial_channel']
    keys = iter(jax.random.split(key, 512))
    p = {}
    p['source_linear'] = {
        'w': 0.5 * jax.random.normal(next(keys), (1, 1), jnp.float32),
        'b': 0.1 * jax.random.normal(next(keys), (1,), jnp.float32),
    }
    p['conv_pre'] = _init_conv(next(keys), uic, cfg['initial_channel'], 7)
    p['cond'] = (_init_conv(next(keys), uic, cfg['gin_channels'], 1)
                 if cfg['gin_channels'] != 0 else None)
    p['ups'], p['noise_convs'] = [], []
    n_up = len(cfg['upsample_rates'])
    for i, (u, k) in enumerate(zip(cfg['upsample_rates'],
                                   cfg['upsample_kernel_sizes'])):
        cin = uic // (2 ** i)
        cout = uic // (2 ** (i + 1))
        kw, kb = jax.random.split(next(keys))
        p['ups'].append({
            'w': 0.05 * jax.random.normal(kw, (cin, cout, k), jnp.float32),
            'b': 0.05 * jax.random.normal(kb, (cout,), jnp.float32),
        })
        if i + 1 < n_up:
            sf = int(np.prod(cfg['upsample_rates'][i + 1:]))
            p['noise_convs'].append(_init_conv(next(keys), cout, 1, 2 * sf))
        else:
            p['noise_convs'].append(_init_conv(next(keys), cout, 1, 1))
    p['resblocks'] = []
    for i in range(n_up):
        ch = uic // (2 ** (i + 1))
        for kk, dil in zip(cfg['resblock_kernel_sizes'],
                           cfg['resblock_dilation_sizes']):
            convs1 = [_init_conv(next(keys), ch, ch, kk) for _ in dil]
            convs2 = [_init_conv(next(keys), ch, ch, kk) for _ in dil]
            p['resblocks'].append({'convs1': convs1, 'convs2': convs2})
    ch = uic // (2 ** n_up)
    p['conv_post'] = _init_conv(next(keys), 1, ch, 7, bias=False)
    return p


# -----------------------------------------------------------------------------
if __name__ == "__main__":
    root = jax.random.PRNGKey(0)
    k_unit, k_params, k_x, k_f0a, k_f0b, k_g, k_noise = jax.random.split(root, 7)

    def _check(name, got, want, tol_scale=1e-2):
        err = float(jnp.max(jnp.abs(got.astype(jnp.float32) -
                                    want.astype(jnp.float32))))
        tol = tol_scale * (1.0 + float(jnp.max(jnp.abs(want))))
        assert err < tol, f"{name}: max_err={err} tol={tol}"

    # ---- unit checks of the Pallas conv kernels vs lax references (f32) ----
    uk = jax.random.split(k_unit, 16)
    f32 = jnp.float32

    # 1) dilated conv, fused pre-leaky-relu, multi-tile (tile_t=128, halo path)
    x1 = jax.random.normal(uk[0], (2, 16, 600), f32)
    w1 = 0.1 * jax.random.normal(uk[1], (24, 16, 5), f32)
    b1 = 0.1 * jax.random.normal(uk[2], (24,), f32)
    out_p = conv1d_pallas(x1, prep_conv(w1, b1, f32), dilation=2, pad_left=4,
                          out_len=600, pre_lrelu=True, tile_t=128)
    out_r = conv1d_ref(_leaky(x1), w1, b1, padding=4, dilation=2)
    _check("conv1d", out_p, out_r)

    # 2) fused ResBlock branch chain (+in-window residual, scale, running sum)
    x2 = jax.random.normal(uk[3], (1, 16, 600), f32)
    c1w = 0.1 * jax.random.normal(uk[4], (16, 16, 5), f32)
    c1b = 0.1 * jax.random.normal(uk[5], (16,), f32)
    c2w = 0.1 * jax.random.normal(uk[6], (16, 16, 5), f32)
    c2b = 0.1 * jax.random.normal(uk[7], (16,), f32)
    a2 = 0.3 * jax.random.normal(uk[8], (1, 16, 600), f32)
    out_p = conv1d_pallas(x2, prep_conv(c1w, c1b, f32), dilation=3, pad_left=8,
                          out_len=600, pre_lrelu=True,
                          cw2=prep_conv(c2w, c2b, f32), mid_pad=2,
                          add_input_residual=True, scale=0.5, add2=a2,
                          tile_t=128)
    t = conv1d_ref(_leaky(x2), c1w, c1b, padding=6, dilation=3)
    t = conv1d_ref(_leaky(t), c2w, c2b, padding=2)
    out_r = (t + x2) * 0.5 + a2
    _check("resblock_chain", out_p, out_r)

    # 3) polyphase transposed conv with fused pre-leaky-relu
    x3 = jax.random.normal(uk[9], (1, 12, 70), f32)
    w3 = 0.1 * jax.random.normal(uk[10], (12, 6, 8), f32)
    b3 = 0.1 * jax.random.normal(uk[11], (6,), f32)
    cwt = prep_conv_transpose(w3, b3, stride=4, padding=2, dtype=f32)
    out_p = conv_transpose1d_pallas(x3, cwt, pre_lrelu=True, tile_t=128)
    out_r = conv_transpose1d_ref(_leaky(x3), w3, b3, stride=4, padding=2)
    _check("conv_transpose", out_p, out_r)

    # 4) strided noise conv (wrapper-side phase split) with fused residual add
    h4 = jax.random.normal(uk[12], (1, 1, 320), f32)
    w4 = 0.1 * jax.random.normal(uk[13], (8, 1, 8), f32)
    b4 = 0.1 * jax.random.normal(uk[14], (8,), f32)
    a4 = 0.3 * jax.random.normal(uk[15], (1, 8, 80), f32)
    cws = prep_conv_strided(w4, b4, stride=4, padding=2, dtype=f32)
    out_p = noise_conv_pallas(h4, cws, add=a4, tile_t=128)
    out_r = conv1d_ref(h4, w4, b4, stride=4, padding=2) + a4
    _check("strided_noise_conv", out_p, out_r)

    # ---- full GeneratorNSF ----
    cfg = dict(
        initial_channel=8,
        resblock='1',
        resblock_kernel_sizes=[3, 5],
        resblock_dilation_sizes=[[1, 3], [1, 3]],
        upsample_rates=[4, 2],
        upsample_initial_channel=32,
        upsample_kernel_sizes=[8, 4],
        gin_channels=4,
        sr=16000,
    )
    params = init_params(k_params, cfg)
    upp = int(np.prod(cfg['upsample_rates']))

    B, T = 2, 16
    x = jax.random.normal(k_x, (B, cfg['initial_channel'], T), jnp.float32)
    voiced = jax.random.uniform(k_f0a, (B, T)) > 0.3
    f0 = jnp.where(voiced,
                   100.0 + 300.0 * jax.random.uniform(k_f0b, (B, T)),
                   0.0).astype(jnp.float32)
    g = jax.random.normal(k_g, (B, cfg['gin_channels'], 1), jnp.float32)

    # end-to-end check of the Pallas path (f32) vs the pure-JAX reference
    kp32 = prepare_params(params, cfg, jnp.float32)
    fwd32 = jax.jit(lambda a, b, c, d: generator_nsf_forward_pallas(kp32, a, b, c, cfg, d))
    ref_fn = jax.jit(lambda a, b, c, d: generator_nsf_forward_ref(params, a, b, c, cfg, d))
    y32 = jax.block_until_ready(fwd32(x, f0, g, k_noise))
    yref = jax.block_until_ready(ref_fn(x, f0, g, k_noise))
    e2e_err = float(jnp.max(jnp.abs(y32 - yref)))
    assert e2e_err < 5e-2, f"end-to-end mismatch vs reference: {e2e_err}"

    # production path: bf16 activations/weights, f32 accumulation/epilogues
    kp16 = prepare_params(params, cfg, jnp.bfloat16)
    fwd16 = jax.jit(lambda a, b, c, d: generator_nsf_forward_pallas(kp16, a, b, c, cfg, d))
    y = jax.block_until_ready(fwd16(x, f0, g, k_noise))

    assert y.shape == (B, 1, T * upp), y.shape
    assert bool(jnp.all(jnp.isfinite(y)))
    print("KERNEL_OK")
</pallas_src>

<mosaic_0001>
module attributes {stable_mosaic.version = 11 : i64} {
  func.func @_conv_tile_kernel(%arg0: i32, %arg1: i32, %arg2: memref<1x16x128xf32, #tpu.memory_space<vmem>>, %arg3: memref<1x16x128xf32, #tpu.memory_space<vmem>>, %arg4: memref<1x16x128xf32, #tpu.memory_space<vmem>>, %arg5: memref<24x80xf32, #tpu.memory_space<vmem>>, %arg6: memref<24x1xf32, #tpu.memory_space<vmem>>, %arg7: memref<1x24x128xf32, #tpu.memory_space<vmem>>) attributes {dimension_semantics = [#tpu.dimension_semantics<parallel>, #tpu.dimension_semantics<parallel>], iteration_bounds = array<i64: 2, 5>, scalar_prefetch = 0 : i64, scratch_operands = 0 : i64, tpu.core_type = #tpu.core_type<tc>, window_params = [{transform_indices = @transform_0, window_bounds = array<i64: 1, 16, 128>}, {transform_indices = @transform_1, window_bounds = array<i64: 1, 16, 128>}, {transform_indices = @transform_2, window_bounds = array<i64: 1, 16, 128>}, {pipeline_mode = #tpu.pipeline_mode<synchronous>, transform_indices = @transform_3, window_bounds = array<i64: 24, 80>}, {pipeline_mode = #tpu.pipeline_mode<synchronous>, transform_indices = @transform_4, window_bounds = array<i64: 24, 1>}, {transform_indices = @transform_5, window_bounds = array<i64: 1, 24, 128>}]} {
    %c0 = arith.constant 0 : index
    %c0_0 = arith.constant 0 : index
    %c0_1 = arith.constant 0 : index
    %0 = vector.load %arg2[%c0, %c0_0, %c0_1] : memref<1x16x128xf32, #tpu.memory_space<vmem>>, vector<1x16x128xf32>
    %1 = vector.shape_cast %0 : vector<1x16x128xf32> to vector<16x128xf32>
    %c0_2 = arith.constant 0 : index
    %c0_3 = arith.constant 0 : index
    %c0_4 = arith.constant 0 : index
    %2 = vector.load %arg3[%c0_2, %c0_3, %c0_4] : memref<1x16x128xf32, #tpu.memory_space<vmem>>, vector<1x16x128xf32>
    %3 = vector.shape_cast %2 : vector<1x16x128xf32> to vector<16x128xf32>
    %c0_5 = arith.constant 0 : index
    %c0_6 = arith.constant 0 : index
    %c0_7 = arith.constant 0 : index
    %4 = vector.load %arg4[%c0_5, %c0_6, %c0_7] : memref<1x16x128xf32, #tpu.memory_space<vmem>>, vector<1x16x128xf32>
    %5 = vector.shape_cast %4 : vector<1x16x128xf32> to vector<16x128xf32>
    %6 = tpu.concatenate %1, %3, %5 in 1 : vector<16x128xf32>, vector<16x128xf32>, vector<16x128xf32> -> vector<16x384xf32>
    %7 = tpu.iota {dimensions = array<i32: 1>} : vector<1x384xi32>
    %c128_i32 = arith.constant 128 : i32
    %8 = arith.muli %arg1, %c128_i32 : i32
    %c128_i32_8 = arith.constant 128 : i32
    %9 = arith.subi %8, %c128_i32_8 : i32
    %10 = vector.broadcast %9 : i32 to vector<1x384xi32>
    %11 = arith.addi %7, %10 : vector<1x384xi32>
    %c0_i32 = arith.constant 0 : i32
    %12 = vector.broadcast %c0_i32 : i32 to vector<1x384xi32>
    %13 = arith.cmpi sge, %11, %12 : vector<1x384xi32>
    %c600_i32 = arith.constant 600 : i32
    %14 = vector.broadcast %c600_i32 : i32 to vector<1x384xi32>
    %15 = arith.cmpi slt, %11, %14 : vector<1x384xi32>
    %16 = arith.andi %13, %15 : vector<1x384xi1>
    %cst = arith.constant 0.000000e+00 : f32
    %17 = vector.broadcast %cst : f32 to vector<16x384xf32>
    %18 = vector.shape_cast %16 : vector<1x384xi1> to vector<1x384xi1>
    %19 = vector.broadcast %18 : vector<1x384xi1> to vector<16x384xi1>
    %20 = arith.select %19, %6, %17 : vector<16x384xi1>, vector<16x384xf32>
    %cst_9 = arith.constant 0.000000e+00 : f32
    %21 = vector.broadcast %cst_9 : f32 to vector<16x384xf32>
    %22 = arith.cmpf oge, %20, %21 : vector<16x384xf32>
    %cst_10 = arith.constant 1.000000e-01 : f32
    %23 = vector.broadcast %cst_10 : f32 to vector<16x384xf32>
    %24 = arith.mulf %20, %23 : vector<16x384xf32>
    %25 = arith.select %22, %20, %24 : vector<16x384xi1>, vector<16x384xf32>
    %26 = vector.extract_strided_slice %25 {offsets = [0, 124], sizes = [16, 128], strides = [1, 1]} : vector<16x384xf32> to vector<16x128xf32>
    %27 = vector.extract_strided_slice %25 {offsets = [0, 126], sizes = [16, 128], strides = [1, 1]} : vector<16x384xf32> to vector<16x128xf32>
    %28 = vector.extract_strided_slice %25 {offsets = [0, 128], sizes = [16, 128], strides = [1, 1]} : vector<16x384xf32> to vector<16x128xf32>
    %29 = vector.extract_strided_slice %25 {offsets = [0, 130], sizes = [16, 128], strides = [1, 1]} : vector<16x384xf32> to vector<16x128xf32>
    %30 = vector.extract_strided_slice %25 {offsets = [0, 132], sizes = [16, 128], strides = [1, 1]} : vector<16x384xf32> to vector<16x128xf32>
    %31 = tpu.concatenate %26, %27, %28, %29, %30 in 0 : vector<16x128xf32>, vector<16x128xf32>, vector<16x128xf32>, vector<16x128xf32>, vector<16x128xf32> -> vector<80x128xf32>
    %c0_11 = arith.constant 0 : index
    %c0_12 = arith.constant 0 : index
    %32 = vector.load %arg5[%c0_11, %c0_12] : memref<24x80xf32, #tpu.memory_space<vmem>>, vector<24x80xf32>
    %cst_13 = arith.constant dense<0.000000e+00> : vector<24x128xf32>
    %33 = tpu.matmul %32, %31, %cst_13 {dimension_numbers = #tpu.dot_dimension_numbers<[1], [0], [0], [1], [0, 0, 1, 1], [], []>} : vector<24x80xf32>, vector<80x128xf32>, vector<24x128xf32> -> vector<24x128xf32>
    %c0_14 = arith.constant 0 : index
    %c0_15 = arith.constant 0 : index
    %34 = vector.load %arg6[%c0_14, %c0_15] : memref<24x1xf32, #tpu.memory_space<vmem>>, vector<24x1xf32>
    %35 = vector.broadcast %34 : vector<24x1xf32> to vector<24x128xf32>
    %36 = arith.addf %33, %35 : vector<24x128xf32>
    %c0_16 = arith.constant 0 : index
    %c0_17 = arith.constant 0 : index
    %c0_18 = arith.constant 0 : index
    %37 = vector.load %arg7[%c0_16, %c0_17, %c0_18] : memref<1x24x128xf32, #tpu.memory_space<vmem>>, vector<1x24x128xf32>
    %38 = vector.shape_cast %37 : vector<1x24x128xf32> to vector<24x128xf32>
    %39 = vector.shape_cast %36 : vector<24x128xf32> to vector<1x24x128xf32>
    tpu.vector_store %arg7[%c0_16, %c0_17, %c0_18], %39 {strides = array<i32>} : memref<1x24x128xf32, #tpu.memory_space<vmem>>, vector<1x24x128xf32>,
    return
  }
  func.func @transform_0(%arg0: i32, %arg1: i32) -> (i32, i32, i32) {
    %c1_i32 = arith.constant 1 : i32
    %0 = arith.muli %arg1, %c1_i32 : i32
    %c1_i32_0 = arith.constant 1 : i32
    %1 = arith.subi %0, %c1_i32_0 : i32
    %c0_i32 = arith.constant 0 : i32
    %2 = arith.maxsi %1, %c0_i32 : i32
    %c0_i32_1 = arith.constant 0 : i32
    %c0_i32_2 = arith.constant 0 : i32
    return %arg0, %c0_i32_1, %2 : i32, i32, i32
  }
  func.func @transform_1(%arg0: i32, %arg1: i32) -> (i32, i32, i32) {
    %c0_i32 = arith.constant 0 : i32
    %c0_i32_0 = arith.constant 0 : i32
    return %arg0, %c0_i32, %arg1 : i32, i32, i32
  }
  func.func @transform_2(%arg0: i32, %arg1: i32) -> (i32, i32, i32) {
    %c1_i32 = arith.constant 1 : i32
    %0 = arith.addi %arg1, %c1_i32 : i32
    %c1_i32_0 = arith.constant 1 : i32
    %1 = arith.muli %0, %c1_i32_0 : i32
    %c4_i32 = arith.constant 4 : i32
    %2 = arith.minsi %1, %c4_i32 : i32
    %c0_i32 = arith.constant 0 : i32
    %c0_i32_1 = arith.constant 0 : i32
    return %arg0, %c0_i32, %2 : i32, i32, i32
  }
  func.func @transform_3(%arg0: i32, %arg1: i32) -> (i32, i32) {
    %c0_i32 = arith.constant 0 : i32
    %c0_i32_0 = arith.constant 0 : i32
    %c0_i32_1 = arith.constant 0 : i32
    return %c0_i32, %c0_i32_0 : i32, i32
  }
  func.func @transform_4(%arg0: i32, %arg1: i32) -> (i32, i32) {
    %c0_i32 = arith.constant 0 : i32
    %c0_i32_0 = arith.constant 0 : i32
    %c0_i32_1 = arith.constant 0 : i32
    return %c0_i32, %c0_i32_0 : i32, i32
  }
  func.func @transform_5(%arg0: i32, %arg1: i32) -> (i32, i32, i32) {
    %c0_i32 = arith.constant 0 : i32
    %c0_i32_0 = arith.constant 0 : i32
    return %arg0, %c0_i32, %arg1 : i32, i32, i32
  }
}

</mosaic_0001>

<bundles_post_ra>
// kernel: tpu_custom_call.1
= control target key start
LH: loop header
LB: loop body
LE: loop exit
PB: predicated region body
PF: predicated region fallthrough
CT: control target
= control target key end

     0   :  { %s2100_s0 = inlined_call_operand.hbm [shape: f32[2,16,600], index: 0, kind: input, shape index: {}]   ;;  %s2101_s1 = inlined_call_operand.hbm [shape: f32[2,16,600], index: 1, kind: input, shape index: {}]   ;;  %s2102_s2 = inlined_call_operand.hbm [shape: f32[2,16,600], index: 2, kind: input, shape index: {}]   ;;  %s2103_s3 = inlined_call_operand.hbm [shape: f32[24,80], index: 3, kind: input, shape index: {}]   ;;  %s2104_s4 = inlined_call_operand.hbm [shape: f32[24,1], index: 4, kind: input, shape index: {}]   ;;  %s2105_s5 = inlined_call_operand.hbm [shape: f32[2,24,600], index: 5, kind: output, shape index: {}]  }
   0x1   :  { %2138 = sst [smem:[#allocation31_spill]] %s2101_s1 }
   0x2   :  { %2139 = sst [smem:[#allocation32_spill]] %s2103_s3 }
   0x3   :  { %2140 = sst [smem:[#allocation33_spill]] %s2104_s4 }
   0x4   :  { %2141 = sst [smem:[#allocation34_spill]] %s2105_s5 }
   0x5   :  { %10 = vsyncpa [#allocation3], 0 }
   0x6   :  { %12 = vsyncpa [#allocation3 + $0x1], 0 }
   0x7   :  { %13 = vsyncpa [#allocation6], 0 }
   0x8   :  { %15 = vsyncpa [#allocation6 + $0x1], 0 }
   0x9   :  { %16 = vsyncpa [#allocation9], 0 }
   0xa   :  { %17 = vsyncpa [#allocation4], 0 }
   0xb   :  { %19 = vsyncpa [#allocation4 + $0x1], 0  ;;  %s1544_s18 = smov 0   ;;  %s1546_s19 = smov 0  }
   0xc   :  { %s1548_s20 = smov 0   ;;  %s1550_s21 = smov 0  }
   0xd   :  { %s1552_s22 = smov 0   ;;  %s1554_s23 = smov 0  }
   0xe   :  { %s1556_s24 = smov 0   ;;  %s1558_s25 = smov 0  }
   0xf   :  { %s1560_s26 = smov 0   ;;  %s1562_s27 = smov 0  }
  0x10   :  { %s1564_s28 = smov 0   ;;  %s1566_s29 = smov 0  }
  0x11   :  { %s1568_s30 = smov 0   ;;  %s1570_s6 = smov 0  }
  0x12 LB: > { %2142 = sst [smem:[#allocation17_spill]] %s1451_s21  ;;  %s1613_s7 = sadd.s32 4294967295, %s1491_s6   ;;  %s1491_s6 = sphi %s1570_s6, %s25_s6   ;;  %s1487_s30 = sphi %s1568_s30, %s2216_s30   ;;  %s1483_s29 = sphi %s1566_s29, %s2227_s29   ;;  %s1479_s28 = sphi %s1564_s28, %s2226_s28   ;;  %s1475_s27 = sphi %s1562_s27, %s2213_s27   ;;  %s1471_s26 = sphi %s1560_s26, %s2225_s26   ;;  %s1467_s25 = sphi %s1558_s25, %s2224_s25   ;;  %s1463_s24 = sphi %s1556_s24, %s2212_s24   ;;  %s1459_s23 = sphi %s1554_s23, %s2223_s23   ;;  %s1455_s22 = sphi %s1552_s22, %s2222_s22   ;;  %s1451_s21 = sphi %s1550_s21, %s2221_s21   ;;  %s1447_s20 = sphi %s1548_s20, %s2220_s20   ;;  %s1443_s19 = sphi %s1546_s19, %s2219_s19   ;;  %s1439_s18 = sphi %s1544_s18, %s2218_s18  }
  0x13   : > { %2143 = sst [smem:[#allocation18_spill]] %s1455_s22  ;;  %p127_p0 = scmp.ne.s32.totalorder %s1443_s19, %s1439_s18 }
  0x14   : > { %2144 = sst [smem:[#allocation19_spill]] %s1467_s25  ;;  %p2106_p1 = scmp.eq.s32.totalorder %s1613_s7, 0 }
  0x15   : > { %2145 = sst [smem:[#allocation20_spill]] %s1475_s27  ;;  %p836_p3 = scmp.ge.s32.totalorder %s1491_s6, 1 }
  0x16   : > { %2146 = sst [smem:[#allocation21_spill]] %s1479_s28  ;;  %p208_p4 = scmp.lt.s32.totalorder %s1491_s6, 11 }
  0x17   : > { %2147 = sst [smem:[#allocation22_spill]] %s1483_s29  ;;  %p1622_p5 = por %p127_p0, %p2106_p1 }
  0x18   : > { %2148 = sst [smem:[#allocation23_spill]] %s1487_s30  ;;  %p1626_p6 = pnand %p836_p3, %p208_p4 }
  0x19   : > { %s2149_s8 = scalar_select %p1622_p5, 1, 0 }
  0x1a   : > { %s2151_s9 = scalar_select %p1626_p6, 1, 0 }
  0x1b   : > { %2150 = sst [smem:[#allocation24_spill]] %s2149_s8  ;;  %s1493_s10 = smov [#allocation8]  }
  0x1c   : > { %2152 = sst [smem:[#allocation25_spill]] %s2151_s9  ;;  %s220_s11 = sshll.u32 %s1493_s10, 4  ;;  %s221_s11 = int_to_ptr.vmem [resolvable:$true] %s220_s11 }
  0x1d   : > { %p949_p7 = pneg %p1626_p6  ;;  %s2154_s3 = sld [smem:[#allocation32_spill]] }
  0x1f   : > { %p1634_p8 = pnand %p949_p7, %p2106_p1 }
  0x21   : > { %p2128_p10 = pneg %p1634_p8 }
  0x23   : > { %s1187_s15 = scalar_lea.hbm %s2154_s3, 384 }
  0x24   : > { %p1188_p9 = scmp.ne.s32.totalorder %s2154_s3, %s1187_s15  ;;  %p1194_p13 = scmp.lt.u32.totalorder %s1187_s15, %s2154_s3 }
  0x26   : > { %p1190_p11 = pnand %p2128_p10, %p1188_p9 }
  0x28   : > { %p1191_p12 = pneg %p1190_p11 }
  0x2a   : > { %p1196_p0 = pnand %p1194_p13, %p1191_p12 }
  0x2c   : > { %1199 = shalt.err (!%p1196_p0)
}
  0x2d   : > { %s1200_s13 = scalar_lea.vmem %s221_s11, 384  ;;  %p1208_p2 = scmp.lt.s32.totalorder %s221_s11, %s221_s11 }
  0x2e   : > { %p1201_p3 = scmp.ne.s32.totalorder %s221_s11, %s1200_s13  ;;  %p1209_p1 = scmp.lt.s32.totalorder %s1200_s13, %s1200_s13 }
  0x30   : > { %p1203_p4 = pnand %p1201_p3, %p2128_p10  ;;  %p1210_p5 = por %p1209_p1, %p1208_p2 }
  0x32   : > { %p1204_p7 = pneg %p1203_p4 }
  0x34   : > { %p1211_p6 = pnand %p1210_p5, %p1204_p7 }
  0x36   : > { %1214 = shalt.err (!%p1211_p6)
}
  0x37   : > { %s2110_s14 = smov 128   ;;  %s2112_s15 = smov 8  }
  0x38   : > { %952 = dma.hbm_to_vmem [thread:$0]  (!%p1634_p8), %s2154_s3, 384, %s221_s11, [#allocation9], %s2110_s14, %s2110_s14, %s2112_s15  }
  0x39   : > { %s833_s18 = sadd.s32 4294967294, %s1491_s6   ;;  %s1665_s10 = sadd.s32 1, %s1483_s29 }
  0x3a   : > { %p2127_p1 = scmp.ge.s32.totalorder %s1665_s10, 5  ;;  %p2126_p2 = scmp.eq.s32.totalorder %s1491_s6, 0 }
  0x3b   : > { %p87_p5 = scmp.ne.s32.totalorder %s1459_s23, %s1455_s22  ;;  %p93_p6 = scmp.ne.s32.totalorder %s1455_s22, %s1451_s21 }
  0x3c   : > { %s1674_s28 = scalar_select %p2127_p1, 0, %s1665_s10  }
  0x3d   : > { %p201_p9 = scmp.eq.s32.totalorder %s833_s18, 9  ;;  %p1684_p11 = por %p87_p5, %p2126_p2 }
  0x3e   : > { %p2156_p12 = scmp.eq.s32.totalorder %s1613_s7, 0  ;;  %p2159_p0 = scmp.eq.s32.totalorder %s1613_s7, 9 }
  0x3f   : > { %p1700_p4 = por %p201_p9, %p93_p6  ;;  %p2125_p7 = scmp.lt.s32.totalorder %s1491_s6, 10 }
  0x40   : > { %p1690_p13 = por %p93_p6, %p2156_p12  ;;  %p1696_p3 = por %p2159_p0, %p87_p5 }
  0x41   : > { %s2162_s11 = scalar_select %p1700_p4, 1, 0 }
  0x42   : > { %s2157_s17 = scalar_select %p1690_p13, 1, 0 }
  0x43   : > { %s2160_s5 = scalar_select %p1696_p3, 1, 0 }
  0x44   : > { %2158 = sst [smem:[#allocation26_spill]] %s2157_s17  ;;  %s1706_s18 = smul.u32 10, %s1487_s30 }
  0x45   : > { %2161 = sst [smem:[#allocation27_spill]] %s2160_s5  ;;  %s272_s13 = sand.u32 1, %s1491_s6  }
  0x46   : > { %2163 = sst [smem:[#allocation28_spill]] %s2162_s11  ;;  %s274_s14 = sand.u32 1, %s1459_s23  }
  0x47   : > { %s843_s15 = sshll.u32 %s274_s14, 4  ;;  %s281_s3 = sadd.s32 %s1483_s29, %s1706_s18 }
  0x48   : > { %s844_s21 = sshll.u32 %s281_s3, 7  ;;  %s2164_s1 = sld [smem:[#allocation31_spill]] }
  0x49   : > { %s276_s5 = scalar_lea.vmem [#allocation5], %s843_s15  ;;  %p1723_p5 = pnand %p2125_p7, %p1684_p11 }
  0x4a   : > { %s284_s11 = sshll.u32 %s276_s5, 4  ;;  %s1496_s3 = smov [#allocation10]   ;;  %s1717_s11 = int_to_ptr.vmem [resolvable:$true] %s284_s11 }
  0x4b   : > { %s1727_s27 = sshll.u32 %s1496_s3, 4  ;;  %p1217_p9 = pneg %p1723_p5  ;;  %s234_s27 = int_to_ptr.vmem [resolvable:$true] %s1727_s27 }
  0x4e   : > { %s1715_s17 = scalar_lea.hbm %s2164_s1, %s844_s21  ;;  %s1729_s21 = scalar_lea.sflag [#allocation6], %s272_s13 }
  0x4f   : > { %2166 = sst [smem:[#allocation29_spill]] %s1729_s21  ;;  %s1215_s8 = scalar_lea.hbm %s1715_s17, 256 }
  0x50   : > { %p1216_p6 = scmp.ne.s32.totalorder %s1715_s17, %s1215_s8  ;;  %s1220_s15 = scalar_lea.hbm %s2164_s1, 2560 }
  0x51   : > { %p1221_p11 = scmp.lt.u32.totalorder %s1715_s17, %s2164_s1  ;;  %p1222_p7 = scmp.lt.u32.totalorder %s1220_s15, %s1215_s8 }
  0x52   : > { %p1218_p12 = pnand %p1217_p9, %p1216_p6  ;;  %p1224_p1 = scmp.lt.u32.totalorder %s1215_s8, %s1715_s17 }
  0x53   : > { %p1223_p2 = por %p1222_p7, %p1221_p11 }
  0x54   : > { %p1219_p0 = pneg %p1218_p12 }
  0x55   : > { %p1225_p10 = por %p1224_p1, %p1223_p2 }
  0x57   : > { %p1226_p4 = pnand %p1225_p10, %p1219_p0 }
  0x59   : > { %1229 = shalt.err (!%p1226_p4)
}
  0x5a   : > { %s1230_s13 = scalar_lea.vmem %s1717_s11, 256  ;;  %s1497_s3 = smov [#allocation5]  }
  0x5b   : > { %p1231_p6 = scmp.ne.s32.totalorder %s1717_s11, %s1230_s13  ;;  %s1235_s5 = sshll.u32 %s1497_s3, 4  ;;  %s1236_s5 = int_to_ptr.vmem [resolvable:$false] %s1235_s5 }
  0x5c   : > { %s1237_s9 = scalar_lea.vmem %s1236_s5, 512  ;;  %p1238_p13 = scmp.lt.s32.totalorder %s1717_s11, %s1236_s5 }
  0x5d   : > { %p1233_p12 = pnand %p1231_p6, %p1217_p9  ;;  %p1239_p7 = scmp.lt.s32.totalorder %s1237_s9, %s1230_s13 }
  0x5f   : > { %p1234_p3 = pneg %p1233_p12  ;;  %p1240_p11 = por %p1239_p7, %p1238_p13 }
  0x61   : > { %p1241_p1 = pnand %p1240_p11, %p1234_p3 }
  0x63   : > { %1244 = shalt.err (!%p1241_p1)
}
  0x64   : > { %s2131_s8 = smov 640   ;;  %s2167_s14 = smov 8  }
  0x65   : > { %s2168_s15 = smov 128   ;;  %s2169_s4 = sld [smem:[#allocation33_spill]] }
  0x66   : > { %962 = dma.hbm_to_vmem [thread:$0]  (!%p1723_p5), %s1715_s17, 256, %s1717_s11, %s1729_s21, %s2131_s8, %s2168_s15, %s2167_s14  }
  0x67   : > { %p2170_p2 = pneg %p1634_p8 }
  0x6b   : > { %s1245_s13 = scalar_lea.hbm %s2169_s4, 384 }
  0x6c   : > { %p1246_p10 = scmp.ne.s32.totalorder %s2169_s4, %s1245_s13  ;;  %p1252_p4 = scmp.lt.u32.totalorder %s1245_s13, %s2169_s4 }
  0x6e   : > { %p1248_p13 = pnand %p1246_p10, %p2170_p2 }
  0x70   : > { %p1249_p3 = pneg %p1248_p13 }
  0x72   : > { %p1254_p9 = pnand %p1252_p4, %p1249_p3 }
  0x74   : > { %1257 = shalt.err (!%p1254_p9)
}
  0x75   : > { %s1258_s11 = scalar_lea.vmem %s234_s27, 384  ;;  %p2171_p0 = pmov %p2170_p2 }
  0x76   : > { %p1259_p5 = scmp.ne.s32.totalorder %s234_s27, %s1258_s11  ;;  %p1266_p7 = scmp.lt.s32.totalorder %s234_s27, %s234_s27 }
  0x77   : > { %p1267_p11 = scmp.lt.s32.totalorder %s1258_s11, %s1258_s11 }
  0x78   : > { %p1261_p6 = pnand %p1259_p5, %p2171_p0 }
  0x79   : > { %p1268_p1 = por %p1267_p11, %p1266_p7 }
  0x7a   : > { %p1262_p12 = pneg %p1261_p6 }
  0x7c   : > { %p1269_p2 = pnand %p1268_p1, %p1262_p12 }
  0x7e   : > { %1272 = shalt.err (!%p1269_p2)
}
  0x7f   : > { %955 = dma.hbm_to_vmem [thread:$0]  (!%p1634_p8), %s2169_s4, 384, %s234_s27, [#allocation9], %s2168_s15, %s2168_s15, %s2167_s14  }
  0x80   : > { %s2172_s16 = sadd.s32 1, %s1487_s30  ;;  %p2173_p10 = scmp.ge.s32.totalorder %s1665_s10, 5 }
  0x81   : > { %s834_s12 = sadd.s32 4294967295, %s1483_s29  ;;  %s835_s3 = sadd.s32 4294967295, %s1674_s28 }
  0x82   : > { %s2229_s16 = smov (!%p2173_p10, %s2172_s16), %s1487_s30  ;;  %p42_p3 = scmp.gt.s32.totalorder %s834_s12, 0 }
  0x83   : > { %p39_p13 = scmp.ge.s32.totalorder %s2229_s16, 2  ;;  %p45_p4 = scmp.gt.s32.totalorder %s835_s3, 0 }
  0x84   : > { %s52_s13 = sadd.s32 1, %s1471_s26  ;;  %s2233_s12 = smov (!%p42_p3, %s834_s12), 0 }
  0x85   : > { %s2231_s16 = smov (%p39_p13, %s2229_s16), 0  ;;  %s2235_s3 = smov (!%p45_p4, %s835_s3), 0 }
  0x86   : > { %2174 = sst [smem:[#allocation30_spill]] %s2231_s16  ;;  %s1796_s27 = ssub.s32 %s1487_s30, %s2231_s16 }
  0x87   : > { %p59_p8 = scmp.ne.s32.totalorder %s1471_s26, %s1467_s25  ;;  %s48_s5 = ssub.s32 %s2233_s12, %s2235_s3 }
  0x88   : > { %p65_p9 = scmp.ne.s32.totalorder %s1467_s25, %s1463_s24  ;;  %s49_s9 = sor.u32 %s48_s5, %s1796_s27 }
  0x89   : > { %p2175_p5 = scmp.eq.s32.totalorder %s1491_s6, 0  ;;  %p50_p6 = scmp.eq.s32.totalorder %s49_s9, 0 }
  0x8a   : > { %p2177_p12 = scmp.eq.s32.totalorder %s1613_s7, 0  ;;  %s2179_s1 = ssub.s32 %s1483_s29, %s1674_s28 }
  0x8b   : > { %p1805_p0 = por %p2175_p5, %p59_p8  ;;  %s77_s17 = sor.u32 %s2179_s1, %s1796_s27 }
  0x8c   : > { %p1811_p7 = por %p2177_p12, %p65_p9  ;;  %s247_s8 = sand.u32 1, %s1471_s26  }
  0x8d   : > { %s1821_s3 = scalar_select %p50_p6, %s1471_s26, %s52_s13  }
  0x8e   : > { %p78_p11 = scmp.eq.s32.totalorder %s77_s17, 0  ;;  %s840_s24 = sshll.u32 %s247_s8, 4 }
  0x8f   : > { %s259_s5 = sadd.s32 %s1706_s18, %s2233_s12  ;;  %s2180_s4 = sadd.s32 1, %s1459_s23 }
  0x90   : > { %s1827_s16 = scalar_select %p78_p11, %s1459_s23, %s2180_s4  }
  0x91   : > { %s842_s30 = sshll.u32 %s259_s5, 7  ;;  %s251_s1 = scalar_lea.vmem [#allocation2], %s840_s24 }
  0x92   : > { %s1832_s9 = scalar_lea.hbm %s2100_s0, %s842_s30  ;;  %s262_s29 = sshll.u32 %s251_s1, 4  ;;  %s1834_s29 = int_to_ptr.vmem [resolvable:$true] %s262_s29 }
  0x93   : > { %p2181_p1 = scmp.lt.s32.totalorder %s1491_s6, 10  ;;  %s1845_s4 = scalar_lea.sflag [#allocation3], %s247_s8 }
  0x94   : > { %s1273_s25 = scalar_lea.hbm %s1832_s9, 256  ;;  %s1278_s13 = scalar_lea.hbm %s2100_s0, 2560 }
  0x95   : > { %p1840_p2 = pnand %p2181_p1, %p1805_p0  ;;  %p1274_p13 = scmp.ne.s32.totalorder %s1832_s9, %s1273_s25 }
  0x96   : > { %p1279_p9 = scmp.lt.u32.totalorder %s1832_s9, %s2100_s0  ;;  %p1280_p5 = scmp.lt.u32.totalorder %s1278_s13, %s1273_s25 }
  0x97   : > { %p1275_p3 = pneg %p1840_p2  ;;  %p1282_p6 = scmp.lt.u32.totalorder %s1273_s25, %s1832_s9 }
  0x98   : > { %p1281_p0 = por %p1280_p5, %p1279_p9 }
  0x99   : > { %p1276_p4 = pnand %p1275_p3, %p1274_p13 }
  0x9a   : > { %p1283_p12 = por %p1282_p6, %p1281_p0 }
  0x9b   : > { %p1277_p8 = pneg %p1276_p4 }
  0x9d   : > { %p1284_p11 = pnand %p1283_p12, %p1277_p8 }
  0x9f   : > { %1287 = shalt.err (!%p1284_p11)
}
  0xa0   : > { %s1288_s8 = scalar_lea.vmem %s1834_s29, 256  ;;  %s1499_s24 = smov [#allocation2]  }
  0xa1   : > { %p1289_p1 = scmp.ne.s32.totalorder %s1834_s29, %s1288_s8  ;;  %s1293_s5 = sshll.u32 %s1499_s24, 4  ;;  %s1294_s5 = int_to_ptr.vmem [resolvable:$false] %s1293_s5 }
  0xa2   : > { %s1295_s1 = scalar_lea.vmem %s1294_s5, 512  ;;  %p1296_p10 = scmp.lt.s32.totalorder %s1834_s29, %s1294_s5 }
  0xa3   : > { %p1291_p13 = pnand %p1289_p1, %p1275_p3  ;;  %p1297_p9 = scmp.lt.s32.totalorder %s1295_s1, %s1288_s8 }
  0xa5   : > { %p1292_p4 = pneg %p1291_p13  ;;  %p1298_p5 = por %p1297_p9, %p1296_p10 }
  0xa7   : > { %p1299_p0 = pnand %p1298_p5, %p1292_p4 }
  0xa9   : > { %1302 = shalt.err (!%p1299_p0)
}
  0xaa   : > { %s2183_s25 = smov 640   ;;  %p2184_p10 = scmp.lt.s32.totalorder %s1665_s10, 4 }
  0xab   : > { %959 = dma.hbm_to_vmem [thread:$0]  (!%p1840_p2), %s1832_s9, 256, %s1834_s29, %s1845_s4, %s2183_s25, %s2168_s15, %s2167_s14  }
  0xac   : > { %s2237_s10 = smov (!%p2184_p10, %s1665_s10), 4  ;;  %s106_s12 = sadd.s32 1, %s1674_s28 }
  0xad   : > { %s114_s30 = sadd.s32 1, %s1447_s20  ;;  %p107_p3 = scmp.lt.s32.totalorder %s106_s12, 4 }
  0xae   : > { %p121_p8 = scmp.ne.s32.totalorder %s1447_s20, %s1443_s19  ;;  %s296_s21 = sand.u32 1, %s1447_s20  }
  0xaf   : > { %s306_s13 = sadd.s32 %s1706_s18, %s2237_s10  ;;  %s2239_s12 = smov (!%p107_p3, %s106_s12), 4 }
  0xb0   : > { %p2185_p6 = scmp.eq.s32.totalorder %s1491_s6, 0  ;;  %s845_s22 = sshll.u32 %s296_s21, 4 }
  0xb1   : > { %s110_s17 = ssub.s32 %s2237_s10, %s2239_s12  ;;  %s846_s24 = sshll.u32 %s306_s13, 7 }
  0xb2   : > { %p123_p12 = por %p121_p8, %p2185_p6  ;;  %s111_s8 = sor.u32 %s110_s17, %s1796_s27 }
  0xb3   : > { %p112_p11 = scmp.eq.s32.totalorder %s111_s8, 0  ;;  %s1891_s9 = scalar_lea.hbm %s2102_s2, %s846_s24 }
  0xb4   : > { %s298_s4 = scalar_lea.vmem [#allocation7], %s845_s22  ;;  %p2186_p2 = scmp.lt.s32.totalorder %s1491_s6, 10 }
  0xb5   : > { %s309_s1 = sshll.u32 %s298_s4, 4  ;;  %s1303_s27 = scalar_lea.hbm %s1891_s9, 256  ;;  %s1902_s1 = int_to_ptr.vmem [resolvable:$true] %s309_s1 }
  0xb6   : > { %p1895_p1 = pnand %p2186_p2, %p123_p12  ;;  %p1304_p13 = scmp.ne.s32.totalorder %s1891_s9, %s1303_s27 }
  0xb7   : > { %s1900_s10 = scalar_select %p112_p11, %s1447_s20, %s114_s30  }
  0xb8   : > { %p1305_p4 = pneg %p1895_p1  ;;  %s1308_s13 = scalar_lea.hbm %s2102_s2, 2560 }
  0xb9   : > { %p1309_p0 = scmp.lt.u32.totalorder %s1891_s9, %s2102_s2  ;;  %p1310_p10 = scmp.lt.u32.totalorder %s1308_s13, %s1303_s27 }
  0xba   : > { %p1306_p9 = pnand %p1305_p4, %p1304_p13  ;;  %p1312_p8 = scmp.lt.u32.totalorder %s1303_s27, %s1891_s9 }
  0xbb   : > { %p1311_p3 = por %p1310_p10, %p1309_p0 }
  0xbc   : > { %p1307_p5 = pneg %p1306_p9 }
  0xbd   : > { %p1313_p6 = por %p1312_p8, %p1311_p3 }
  0xbf   : > { %p1314_p12 = pnand %p1313_p6, %p1307_p5 }
  0xc1   : > { %1317 = shalt.err (!%p1314_p12)
}
  0xc2   : > { %s1318_s30 = scalar_lea.vmem %s1902_s1, 256  ;;  %s1500_s8 = smov [#allocation7]  }
  0xc3   : > { %p1319_p11 = scmp.ne.s32.totalorder %s1902_s1, %s1318_s30  ;;  %s1323_s24 = sshll.u32 %s1500_s8, 4  ;;  %s1324_s24 = int_to_ptr.vmem [resolvable:$false] %s1323_s24 }
  0xc4   : > { %s1325_s5 = scalar_lea.vmem %s1324_s24, 512  ;;  %p1326_p9 = scmp.lt.s32.totalorder %s1902_s1, %s1324_s24 }
  0xc5   : > { %p1321_p2 = pnand %p1319_p11, %p1305_p4  ;;  %p1327_p0 = scmp.lt.s32.totalorder %s1325_s5, %s1318_s30 }
  0xc7   : > { %p1322_p13 = pneg %p1321_p2  ;;  %p1328_p10 = por %p1327_p0, %p1326_p9 }
  0xc9   : > { %p1329_p3 = pnand %p1328_p10, %p1322_p13 }
  0xcb   : > { %1332 = shalt.err (!%p1329_p3)
}
  0xcc   : > { %s2188_s29 = sld [smem:[#allocation29_spill]]  ;;  %s2189_s4 = sld [smem:[#allocation25_spill]] }
  0xd2   : > { %965 = dma.hbm_to_vmem [thread:$0]  (!%p1895_p1), %s1891_s9, 256, %s1902_s1, %s2188_s29, %s2183_s25, %s2168_s15, %s2167_s14  }
  0xd3   : > { %p2190_p4 = scmp.ne.s32.totalorder %s2189_s4, 0 }
  0xd4   : > { %s2191_s27 = sld [smem:[#allocation19_spill]] (!%p2190_p4) }
  0xd5   : > { %321 = sbr.rel (%p2190_p4) target bundleno = 757 (0x2f5), region = 40 }
  0xda   : > { %s323_s12 = sand.u32 (!%p2190_p4), 1, %s2191_s27  }
  0xdb   : > { %s1936_s21 = sshll.u32 (!%p2190_p4), %s323_s12, 4  ;;  %s324_s13 = scalar_lea.sflag (!%p2190_p4), [#allocation3], %s323_s12 }
  0xdc   : > { %s327_s22 = scalar_lea.vmem [#allocation2], %s1936_s21 }
  0xdd   : > { %1418 = dma.done.wait (%p1811_p7), %s324_s13, 256  }
  0xde   : > { %1420 = vsyncadd (%p1811_p7), %s324_s13, 4294967040  ;;  %s2192_s18 = sld [smem:[#allocation18_spill]]  ;;  %s2193_s17 = sld [smem:[#allocation26_spill]] }
  0xdf   : > { %s332_s14 = sand.u32 1, %s1613_s7  }
  0xe0   : > { %s333_s9 = scalar_lea.sflag [#allocation6], %s332_s14 }
  0xe4   : > { %s1945_s15 = sand.u32 1, %s2192_s18   ;;  %p2194_p1 = scmp.ne.s32.totalorder %s2193_s17, 0 }
  0xe5   : > { %s849_s25 = sshll.u32 %s1945_s15, 4 }
  0xe6   : > { %s336_s1 = scalar_lea.vmem [#allocation5], %s849_s25 }
  0xe7   : > { %1422 = dma.done.wait (%p2194_p1), %s333_s9, 256  }
  0xe8   : > { %1424 = vsyncadd (%p2194_p1), %s333_s9, 4294967040  ;;  %s2195_s30 = sld [smem:[#allocation24_spill]]  ;;  %s343_s8 = sand.u32 1, %s1443_s19  }
  0xe9   : > { %s1953_s11 = sshll.u32 %s343_s8, 4 }
  0xea   : > { %s345_s24 = scalar_lea.vmem [#allocation7], %s1953_s11 }
  0xee   : > { %p2196_p7 = scmp.ne.s32.totalorder %s2195_s30, 0 }
  0xf0   : > { %1426 = dma.done.wait (%p2196_p7), %s333_s9, 256  }
  0xf1   : > { %1428 = vsyncadd (%p2196_p7), %s333_s9, 4294967040  ;;  %p2197_p5 = scmp.eq.s32.totalorder %s1613_s7, 0 }
  0xf3   : > { %1430 = dma.done.wait (%p2197_p5), [#allocation9], 768   ;;  %p2198_p8 = pmov %p2197_p5 }
  0xf4   : > { %s2199_s5 = sld [smem:[#allocation20_spill]]  ;;  %v402_v0 = vlaneseq  ;;  %v396_v8 = vld [vmem:[%s327_s22] sm:$0xff]  ;;  %v397_v9 = vld [vmem:[%s327_s22 + $0x8] sm:$0xff]  ;;  %s1501_s7 = smov 126   ;;  %v1506_v38 = vmov 0.0|0.0   ;;  %vm463_vm15 = vcmask 1031168  }
  0xf5   : > { %1432 = vsyncadd (%p2198_p8), [#allocation9], 4294966528  ;;  %v398_v10 = vld [vmem:[%s336_s1] sm:$0xff]  ;;  %v399_v11 = vld [vmem:[%s336_s1 + $0x8] sm:$0xff]  ;;  %s1502_s27 = smov 124   ;;  %s1503_s12 = smov 122   ;;  %903 = vmatprep.subr.bf16.mxu0 %v1506_v38  ;;  %918 = vmatprep.subr.bf16.mxu1 %v1506_v38 }
  0xf6   : > { %v403_v1 = vand.u32 127, %v402_v0  ;;  %v400_v14 = vld [vmem:[%s345_s24] sm:$0xff]  ;;  %v401_v19 = vld [vmem:[%s345_s24 + $0x8] sm:$0xff]  ;;  %s1504_s21 = smov 120   ;;  %s1505_s13 = smov 4   ;;  %v1509_v18 = vmov 0  }
  0xf7   : > { %1186 = vset.pattern.permute.xlu1 %v1509_v18  ;;  %1185 = vset.pattern.permute.xlu0 %v1509_v18  ;;  %s2202_s22 = sld [smem:[#allocation21_spill]]  ;;  %s931_s17 = smul.u32 24, %s1945_s15 }
  0xf8   : > { %v404_v3 = vadd.s32 128, %v403_v1  ;;  %v405_v5 = vadd.s32 256, %v403_v1  ;;  %s2203_s1 = sld [smem:[#allocation27_spill]]  ;;  %s2204_s24 = sld [smem:[#allocation34_spill]] }
  0xf9   : > { %s389_s25 = scalar_lea.vmem [#allocation11], %s931_s17 }
  0xfa   : > { %s853_s29 = sshll.u32 %s2199_s5, 7  ;;  %s678_s9 = sshll.u32 %s389_s25, 4  ;;  %s2017_s9 = int_to_ptr.vmem [resolvable:$true] %s678_s9 }
  0xfb   : > { %s854_s4 = sadd.s32 4294967168, %s853_s29 }
  0xfc   : > { %v408_v2 = vstv %s854_s4  ;;  %s664_s4 = scalar_lea.sflag [#allocation4], %s1945_s15 }
  0xfd   : > { %v409_v4 = vadd.s32 %v408_v2, %v403_v1  ;;  %v410_v6 = vadd.s32 %v408_v2, %v404_v3  ;;  %v411_v7 = vadd.s32 %v408_v2, %v405_v5  ;;  %s932_s18 = smul.u32 15, %s2202_s22 }
  0xfe   : > { %p2206_p12 = scmp.ne.s32.totalorder %s2203_s1, 0 }
  0xff   : > { %vm412_vm0 = vcmp.ge.s32.totalorder %v409_v4, 0  ;;  %vm415_vm1 = vcmp.lt.s32.totalorder %v409_v4, 600  ;;  %vm413_vm2 = vcmp.ge.s32.totalorder %v410_v6, 0  ;;  %vm416_vm3 = vcmp.lt.s32.totalorder %v410_v6, 600  ;;  %s675_s14 = sadd.s32 %s2199_s5, %s932_s18  ;;  %s2205_s5 = smov %s2204_s24 }
 0x100   : > { %vm418_vm4 = vmand %vm412_vm0, %vm415_vm1  ;;  %vm414_vm5 = vcmp.ge.s32.totalorder %v411_v7, 0  ;;  %vm417_vm6 = vcmp.lt.s32.totalorder %v411_v7, 600  ;;  %vm480_vm0 = vcmask 998400   ;;  %vm491_vm1 = vcmask 982016   ;;  %s858_s30 = sshll.u32 %s675_s14, 7 }
 0x101   : > { %vm419_vm7 = vmand %vm413_vm2, %vm416_vm3  ;;  %v427_v12 = vsel %vm418_vm4, %v396_v8, 0.0  ;;  %v430_v13 = vsel %vm418_vm4, %v397_v9, 0.0  ;;  %vm551_vm2 = vcmask 31744   ;;  %vm1507_vm3 = vmmov 0   ;;  %s2022_s29 = scalar_lea.hbm %s2204_s24, %s858_s30 }
 0x102   : > { %v428_v15 = vsel %vm419_vm7, %v398_v10, 0.0  ;;  %v431_v16 = vsel %vm419_vm7, %v399_v11, 0.0  ;;  %vm433_vm8 = vcmp.ge.f32.partialorder %v427_v12, 0.0  ;;  %v439_v17 = vmul.f32 0.1, %v427_v12  ;;  %vm1967_vm9 = vmand %vm414_vm5, %vm417_vm6 }
 0x103   : > { %vm434_vm10 = vcmp.ge.f32.partialorder %v428_v15, 0.0  ;;  %v440_v20 = vmul.f32 0.1, %v428_v15  ;;  %v442_v21 = vmul.f32 0.1, %v430_v13  ;;  %vm436_vm11 = vcmp.ge.f32.partialorder %v430_v13, 0.0 }
 0x104   : > { %v443_v22 = vmul.f32 0.1, %v431_v16  ;;  %v445_v23 = vsel %vm433_vm8, %v427_v12, %v439_v17  ;;  %vm437_vm12 = vcmp.ge.f32.partialorder %v431_v16, 0.0  ;;  %v429_v24 = vsel %vm1967_vm9, %v400_v14, 0.0  ;;  %v497_v17 = vld [vmem:[#allocation10] sm:$0xff] }
 0x105   : > { %v446_v25 = vsel %vm434_vm10, %v428_v15, %v440_v20  ;;  %v448_v26 = vsel %vm436_vm11, %v430_v13, %v442_v21  ;;  %vm435_vm13 = vcmp.ge.f32.partialorder %v429_v24, 0.0  ;;  %v441_v27 = vmul.f32 0.1, %v429_v24 }
 0x106   : > { %v1105_v28 = vpack.i.bf16 %v446_v25, %v445_v23  ;;  %v449_v29 = vsel %vm437_vm12, %v431_v16, %v443_v22  ;;  %v432_v30 = vsel %vm1967_vm9, %v401_v19, 0.0  ;;  %v1508_v8 = vmov 0.0   ;;  %v498_v16 = vld [vmem:[#allocation10 + $0x8] sm:$0xff]  ;;  %v499_v19 = vld [vmem:[#allocation10 + $0x10] sm:$0xff] }
 0x107   : > { %v1115_v31 = vpack.i.bf16 %v449_v29, %v446_v25  ;;  %v447_v32 = vsel %vm435_vm13, %v429_v24, %v441_v27  ;;  %vm438_vm14 = vcmp.ge.f32.partialorder %v432_v30, 0.0  ;;  %v1110_v33 = vpack.i.bf16 %v449_v29, %v448_v26  ;;  %897 = vmatprep.mubr.msk.f32.mxu1 %vm1507_vm3, %v1508_v8  ;;  %894 = vmatprep.mubr.msk.f32.mxu0 %vm1507_vm3, %v1508_v8 }
 0x108   : > { %1106 = vrot.lane.b32.xlu0 %v1105_v28, %s1501_s7  ;;  %v444_v34 = vmul.f32 0.1, %v432_v30  ;;  %v1120_v35 = vpack.i.bf16 %v447_v32, %v446_v25  ;;  %vm570_vm4 = vcmask 654336  }
 0x109   : > { %1116 = vrot.lane.b32.xlu1 %v1115_v31, %s1502_s27  ;;  %s1510_s27 = smov [#allocation11]  }
 0x10a   : > { %v450_v36 = vsel %vm438_vm14, %v432_v30, %v444_v34 }
 0x10b   : > { %v1125_v37 = vpack.i.bf16 %v450_v36, %v449_v29 }
 0x10c   : > { %1111 = vrot.lane.b32.xlu0 %v1110_v33, %s1501_s7  ;;  %s1333_s7 = scalar_lea.vmem %s2017_s9, 384 }
 0x10d   : > { %1121 = vrot.lane.b32.xlu1 %v1120_v35, %s1503_s12  ;;  %p1334_p6 = scmp.ne.s32.totalorder %s2017_s9, %s1333_s7 }
 0x10f   : > { %p1335_p11 = pnand %p1334_p6, %p2206_p12 }
 0x110   : > { %1126 = vrot.lane.b32.xlu0 %v1125_v37, %s1503_s12  ;;  %s1337_s12 = sshll.u32 %s1510_s27, 4  ;;  %s1338_s12 = int_to_ptr.vmem [resolvable:$false] %s1337_s12 }
 0x111   : > { %1131 = vrot.lane.b32.xlu1 %v1120_v35, %s1504_s21  ;;  %p1336_p2 = pneg %p1335_p11  ;;  %p1340_p13 = scmp.lt.s32.totalorder %s2017_s9, %s1338_s12 }
 0x114   : > { %1136 = vrot.lane.b32.xlu0 %v1125_v37, %s1504_s21  ;;  %s1339_s21 = scalar_lea.vmem %s1338_s12, 768 }
 0x115   : > { %1141 = vrot.lane.b32.xlu1 %v1105_v28, %s1505_s13  ;;  %p1341_p9 = scmp.lt.s32.totalorder %s1339_s21, %s1333_s7 }
 0x117   : > { %p1342_p0 = por %p1341_p9, %p1340_p13 }
 0x118   : > { %1146 = vrot.lane.b32.xlu0 %v1110_v33, %s1505_s13 }
 0x119   : > { %p1343_p10 = pnand %p1342_p0, %p1336_p2 }
 0x17a   : > { %v1107_v39 = vpop.permute.xlu0 %1106 }
 0x17b   : > { %v1109_v40 = vunpack.i.h.bf16 %v1107_v39  ;;  %v1108_v41 = vunpack.i.l.bf16 %v1107_v39  ;;  %v1117_v42 = vpop.permute.xlu1 %1116 }
 0x17d   : > { %v464_v43 = vsel %vm463_vm15, %v1108_v41, %v1109_v40 }
 0x17e   : > { %v1150_v44 = vpack.i.bf16 %v1109_v40, %v464_v43  ;;  %v1112_v45 = vpop.permute.xlu0 %1111 }
 0x17f   : > { %v1114_v46 = vunpack.i.h.bf16 %v1112_v45  ;;  %v1113_v47 = vunpack.i.l.bf16 %v1112_v45  ;;  %v1122_v48 = vpop.permute.xlu1 %1121 }
 0x180   : > { %1151 = vrot.lane.b32.xlu1 %v1150_v44, %s1505_s13  ;;  %v1124_v49 = vunpack.i.h.bf16 %v1122_v48  ;;  %v1123_v50 = vunpack.i.l.bf16 %v1122_v48 }
 0x181   : > { %v465_v51 = vsel %vm463_vm15, %v1113_v47, %v1114_v46 }
 0x182   : > { %v1155_v52 = vpack.i.bf16 %v1114_v46, %v465_v51  ;;  %v481_v53 = vsel %vm480_vm0, %v1123_v50, %v1124_v49  ;;  %v1127_v54 = vpop.permute.xlu0 %1126 }
 0x183   : > { %v1129_v55 = vunpack.i.h.bf16 %v1127_v54  ;;  %v1128_v56 = vunpack.i.l.bf16 %v1127_v54  ;;  %v1132_v57 = vpop.permute.xlu1 %1131  ;;  %v1165_v58 = vpack.i.bf16 %v481_v53, %v1123_v50  ;;  %v494_v53 = vld [vmem:[#allocation8] sm:$0xff]  ;;  %v496_v54 = vld [vmem:[#allocation8 + $0x10] sm:$0xff] }
 0x184   : > { %1156 = vrot.lane.b32.xlu0 %v1155_v52, %s1505_s13  ;;  %1161 = vrot.lane.b32.xlu1 %v1117_v42, %s1505_s13  ;;  %v1134_v59 = vunpack.i.h.bf16 %v1132_v57  ;;  %v1133_v60 = vunpack.i.l.bf16 %v1132_v57  ;;  %v495_v52 = vld [vmem:[#allocation8 + $0x8] sm:$0xff] }
 0x185   : > { %v482_v61 = vsel %vm480_vm0, %v1128_v56, %v1129_v55 }
 0x186   : > { %v1170_v62 = vpack.i.bf16 %v482_v61, %v1128_v56  ;;  %v492_v63 = vsel %vm491_vm1, %v1133_v60, %v1134_v59  ;;  %v1137_v0 = vpop.permute.xlu0 %1136 }
 0x187   : > { %v1175_v1 = vpack.i.bf16 %v492_v63, %v1133_v60  ;;  %v1139_v2 = vunpack.i.h.bf16 %v1137_v0  ;;  %v1138_v3 = vunpack.i.l.bf16 %v1137_v0  ;;  %v1142_v4 = vpop.permute.xlu1 %1141 }
 0x188   : > { %1166 = vrot.lane.b32.xlu0 %v1165_v58, %s1505_s13  ;;  %1171 = vrot.lane.b32.xlu1 %v1170_v62, %s1505_s13  ;;  %v1144_v5 = vunpack.i.h.bf16 %v1142_v4  ;;  %v1143_v6 = vunpack.i.l.bf16 %v1142_v4 }
 0x189   : > { %v493_v7 = vsel %vm491_vm1, %v1138_v3, %v1139_v2 }
 0x18a   : > { %v1180_v9 = vpack.i.bf16 %v493_v7, %v1138_v3  ;;  %v1147_v10 = vpop.permute.xlu0 %1146  ;;  %v552_v13 = vsel %vm551_vm2, %v1143_v6, %v1144_v5 }
 0x18b   : > { %v1149_v11 = vunpack.i.h.bf16 %v1147_v10  ;;  %v1148_v12 = vunpack.i.l.bf16 %v1147_v10 }
 0x18c   : > { %1176 = vrot.lane.b32.xlu0 %v1175_v1, %s1505_s13  ;;  %1181 = vrot.lane.b32.xlu1 %v1180_v9, %s1505_s13 }
 0x18d   : > { %v553_v14 = vsel %vm551_vm2, %v1148_v12, %v1149_v11 }
 0x18e   : > { %v904_v15 = vpack.c.bf16 %v553_v14, %v552_v13 }
 0x190   : > { %905 = vmatpush3.bf16.msra.mxu0 %v904_v15  ;;  %923 = vmatpush3.bf16.msra.mxu1 %v904_v15 }
 0x191   : > { %906 = vmatprep.subr.bf16.mxu0 %v1506_v38  ;;  %919 = vmatprep.subr.bf16.mxu1 %v1506_v38 }
 0x192   : > { %507 = vperm.xlu1 %1186, %v498_v16   ;;  %502 = vperm.xlu0 %1185, %v497_v17  }
 0x196   : > { %512 = vperm.xlu1 %1186, %v499_v19  }
 0x1f2   : > { %v1152_v20 = vpop.permute.xlu1 %1151 }
 0x1f3   : > { %v1154_v21 = vunpack.i.h.bf16 %v1152_v20  ;;  %v1153_v22 = vunpack.i.l.bf16 %v1152_v20 }
 0x1f5   : > { %v554_v27 = vsel %vm551_vm2, %v1153_v22, %v1154_v21 }
 0x1f6   : > { %v1157_v23 = vpop.permute.xlu0 %1156  ;;  %v1162_v24 = vpop.permute.xlu1 %1161 }
 0x1f7   : > { %v1159_v25 = vunpack.i.h.bf16 %v1157_v23  ;;  %v1158_v26 = vunpack.i.l.bf16 %v1157_v23  ;;  %v1164_v29 = vunpack.i.h.bf16 %v1162_v24  ;;  %v1163_v30 = vunpack.i.l.bf16 %v1162_v24 }
 0x1f9   : > { %v555_v28 = vsel %vm551_vm2, %v1158_v26, %v1159_v25  ;;  %v910_v41 = vpack.c.bf16 %v1164_v29, %v1163_v30 }
 0x1fa   : > { %v907_v31 = vpack.c.bf16 %v555_v28, %v554_v27  ;;  %v1167_v32 = vpop.permute.xlu0 %1166  ;;  %v1172_v33 = vpop.permute.xlu1 %1171 }
 0x1fb   : > { %v1169_v34 = vunpack.i.h.bf16 %v1167_v32  ;;  %v1168_v35 = vunpack.i.l.bf16 %v1167_v32  ;;  %v1174_v36 = vunpack.i.h.bf16 %v1172_v33  ;;  %v1173_v37 = vunpack.i.l.bf16 %v1172_v33 }
 0x1fc   : > { %908 = vmatpush3.bf16.msra.mxu0 %v907_v31  ;;  %924 = vmatpush3.bf16.msra.mxu1 %v907_v31 }
 0x1fd   : > { %909 = vmatprep.subr.bf16.mxu0 %v1506_v38  ;;  %920 = vmatprep.subr.bf16.mxu1 %v1506_v38  ;;  %v556_v39 = vsel %vm551_vm2, %v1168_v35, %v1169_v34  ;;  %v557_v40 = vsel %vm551_vm2, %v1173_v37, %v1174_v36 }
 0x1fe   : > { %v1177_v42 = vpop.permute.xlu0 %1176  ;;  %v1182_v43 = vpop.permute.xlu1 %1181  ;;  %v913_v48 = vpack.c.bf16 %v557_v40, %v556_v39 }
 0x1ff   : > { %v1179_v44 = vunpack.i.h.bf16 %v1177_v42  ;;  %v1178_v45 = vunpack.i.l.bf16 %v1177_v42  ;;  %v1184_v46 = vunpack.i.h.bf16 %v1182_v43  ;;  %v1183_v47 = vunpack.i.l.bf16 %v1182_v43 }
 0x200   : > { %911 = vmatpush3.bf16.msra.mxu0 %v910_v41  ;;  %925 = vmatpush3.bf16.msra.mxu1 %v910_v41 }
 0x201   : > { %912 = vmatprep.subr.bf16.mxu0 %v1506_v38  ;;  %921 = vmatprep.subr.bf16.mxu1 %v1506_v38  ;;  %v558_v49 = vsel %vm551_vm2, %v1178_v45, %v1179_v44  ;;  %v559_v50 = vsel %vm551_vm2, %v1183_v47, %v1184_v46 }
 0x202   : > { %v916_v51 = vpack.c.bf16 %v559_v50, %v558_v49 }
 0x204   : > { %914 = vmatpush3.bf16.msra.mxu0 %v913_v48  ;;  %926 = vmatpush3.bf16.msra.mxu1 %v913_v48 }
 0x205   : > { %915 = vmatprep.subr.bf16.mxu0 %v1506_v38  ;;  %922 = vmatprep.subr.bf16.mxu1 %v1506_v38 }
 0x208   : > { %917 = vmatpush3.bf16.msra.mxu0 %v916_v51  ;;  %927 = vmatpush3.bf16.msra.mxu1 %v916_v51 }
 0x20b   : > { %898 = vmatmul.mubr.msk.f32.vlgmr.msra.gmra.mrb[0].mxu1 %vm570_vm4, %v495_v52  ;;  %895 = vmatmul.mubr.msk.f32.vlgmr.msra.gmra.mrb[0].mxu0 %vm570_vm4, %v494_v53 }
 0x20c   : > { %900 = vmatprep.mubr.msk.f32.mxu1 %vm1507_vm3, %v1508_v8 }
 0x20f   : > { %901 = vmatmul.mubr.msk.f32.gmra.mrb[2].mxu1 %vm570_vm4, %v496_v54 }
 0x211   : > { %v508_v55 = vpop.permute.xlu1 %507  ;;  %v503_v56 = vpop.permute.xlu0 %502 }
 0x215   : > { %v513_v62 = vpop.permute.xlu1 %512 }
 0x2de   : > { %v651_v57 = vpop.f32.mrb[0].mxu1  ;;  %v646_v38 = vpop.f32.mrb[0].mxu0 }
 0x2df   : > { %v652_v58 = vadd.f32 %v651_v57, %v508_v55  ;;  %v899_v59 = vpop.f32.mrb[1].mxu1  ;;  %v647_v60 = vadd.f32 %v646_v38, %v503_v56  ;;  %v896_v61 = vpop.f32.mrb[1].mxu0 }
 0x2e1   : > { %661 = vst [vmem:[%s389_s25 + $0x8] sm:$0xff] %v652_v58  ;;  %660 = vst [vmem:[%s389_s25] sm:$0xff] %v647_v60 }
 0x2e2   : > { %v656_v63 = vpop.f32.mrb[2].mxu1 }
 0x2e3   : > { %v657_v0 = vadd.f32 %v656_v63, %v513_v62  ;;  %v902_v1 = vpop.f32.mrb[3].mxu1 }
 0x2e5   : > { %662 = vst [vmem:[%s389_s25 + $0x10] sm:$0xff] %v657_v0 }
 0x2e6   : > { %1346 = shalt.err (!%p1343_p10)
}
 0x2e7   : > { %s1347_s13 = scalar_lea.hbm %s2022_s29, 384  ;;  %s1351_s17 = scalar_lea.hbm %s2205_s5, 3840 }
 0x2e8   : > { %p1348_p3 = scmp.ne.s32.totalorder %s2022_s29, %s1347_s13  ;;  %p1352_p7 = scmp.lt.u32.totalorder %s2022_s29, %s2205_s5 }
 0x2e9   : > { %p1353_p5 = scmp.lt.u32.totalorder %s1351_s17, %s1347_s13  ;;  %p1355_p6 = scmp.lt.u32.totalorder %s1347_s13, %s2022_s29 }
 0x2ea   : > { %p1349_p4 = pnand %p1348_p3, %p2206_p12 }
 0x2eb   : > { %p1354_p8 = por %p1353_p5, %p1352_p7 }
 0x2ec   : > { %p1350_p1 = pneg %p1349_p4 }
 0x2ed   : > { %p1356_p11 = por %p1355_p6, %p1354_p8 }
 0x2ef   : > { %p1357_p2 = pnand %p1356_p11, %p1350_p1 }
 0x2f1   : > { %1360 = shalt.err (!%p1357_p2)
}
 0x2f2   : > { %s1511_s30 = smov 128   ;;  %s1512_s8 = smov 640  }
 0x2f3   : > { %s1513_s11 = smov 8  }
 0x2f4   : > { %947 = dma.vmem_to_hbm [thread:$0]  (%p2206_p12), %s2017_s9, 384, %s2022_s29, %s664_s4, %s1511_s30, %s1512_s8, %s1513_s11  }
 0x2f5 PF: > { %s2207_s24 = sld [smem:[#allocation17_spill]]  ;;  %s2208_s7 = sld [smem:[#allocation28_spill]] }
 0x2f6   : > { %p975_p13 = scmp.ge.s32.totalorder %s1491_s6, 2 }
 0x2fb   : > { %s693_s27 = sand.u32 1, %s2207_s24   ;;  %p2209_p9 = scmp.ne.s32.totalorder %s2208_s7, 0 }
 0x2fc   : > { %s694_s12 = scalar_lea.sflag [#allocation4], %s693_s27 }
 0x2fd   : > { %p967_p0 = pnand %p975_p13, %p2209_p9 }
 0x2ff   : > { %1434 = dma.done.wait (!%p967_p0), %s694_s12, 384  }
 0x300   : > { %1436 = vsyncadd (!%p967_p0), %s694_s12, 4294966912  ;;  %s25_s6 = sadd.s32 1, %s1491_s6   ;;  %s2211_s15 = sld [smem:[#allocation18_spill]] }
 0x301   : > { %p2053_p10 = scmp.ge.s32.totalorder %s25_s6, 12   ;;  %s2212_s24 = sld [smem:[#allocation19_spill]] }
 0x302   : > { %s2213_s27 = sld [smem:[#allocation22_spill]]  ;;  %s2214_s9 = sld [smem:[#allocation23_spill]] }
 0x303   : > { %s2215_s1 = smov %s1674_s28  ;;  %s2216_s30 = sld [smem:[#allocation30_spill]] }
 0x304   : > { %s2218_s18 = smov %s1443_s19  ;;  %s2219_s19 = smov %s1447_s20 }
 0x305   : > { %s2220_s20 = smov %s1900_s10  ;;  %s2222_s22 = smov %s1459_s23 }
 0x306   : > { %s2221_s21 = smov %s2211_s15  ;;  %s2223_s23 = smov %s1827_s16 }
 0x307   : > { %s2224_s25 = smov %s1471_s26  ;;  %s2225_s26 = smov %s1821_s3 }
 0x308   : > { %s2226_s28 = smov %s2214_s9  ;;  %s2227_s29 = smov %s2215_s1 }
 0x309   :  { %24 = sbr.rel (!%p2053_p10) target bundleno = 18 (0x12), region = 117 }
 0x310   :  { %699 = vsyncpa [#allocation3], 1 }
 0x311   :  { %701 = vsyncpa [#allocation3 + $0x1], 1 }
 0x312   :  { %702 = vsyncpa [#allocation6], 1 }
 0x313   :  { %704 = vsyncpa [#allocation6 + $0x1], 1 }
 0x314   :  { %705 = vsyncpa [#allocation9], 1 }
 0x315   :  { %706 = vsyncpa [#allocation4], 1 }
 0x316   :  { %708 = vsyncpa [#allocation4 + $0x1], 1 }

</bundles_post_ra>
